<compile_context>
chip_gen: v5e
topology: v5e:2x2
jax: 0.10.0
libtpu: 0.0.40
codegen_flags: <defaults>
</compile_context>

<pallas_src>
import jax
import jax.numpy as jnp
from jax.experimental import pallas as pl
from jax.experimental.pallas import tpu as pltpu


# Packing order of the [C, 5] constant-column block.
_G1, _BE1, _B2, _G2, _BE2 = range(5)


# ----------------------------------------------------------------------------
# Kernel: residual + LN1 + (chunked) FFN + residual + LN2 in [C, T] layout.
# ----------------------------------------------------------------------------
def _make_kernel(f_chunk, n_f_chunks):
    def kernel(x_ref, attn_ref, cols_ref, w1_ref, b1_ref, w2_ref, out_ref):
        f32 = jnp.float32
        bf16 = jnp.bfloat16

        x = x_ref[...].astype(f32)                      # [C, T]
        cols = cols_ref[...]                            # [C, 5]
        g1 = cols[:, _G1:_G1 + 1]
        be1 = cols[:, _BE1:_BE1 + 1]
        b2 = cols[:, _B2:_B2 + 1]
        g2 = cols[:, _G2:_G2 + 1]
        be2 = cols[:, _BE2:_BE2 + 1]

        inv_c = 1.0 / x.shape[0]

        # --- residual + LayerNorm1 (single-pass stats over channels) --------
        y = x + attn_ref[...]                           # broadcast [C,1] column
        mu = jnp.sum(y, axis=0, keepdims=True) * inv_c
        ex2 = jnp.sum(y * y, axis=0, keepdims=True) * inv_c
        var = ex2 - mu * mu
        y = (y - mu) * jax.lax.rsqrt(var + 1e-5) * g1 + be1

        y_bf = y.astype(bf16)

        # --- FFN: Linear -> ReLU -> Linear (bf16 operands, f32 accumulate),
        #     hidden dimension chunked so [F, T] never fully materialises ----
        if n_f_chunks == 1:
            h = jnp.maximum(
                jnp.dot(w1_ref[...], y_bf, preferred_element_type=f32)
                + b1_ref[...], 0.0).astype(bf16)
            z = jnp.dot(w2_ref[...], h, preferred_element_type=f32)
        else:
            def body(i, z_acc):
                f0 = pl.multiple_of(i * f_chunk, f_chunk)
                w1c = w1_ref[pl.ds(f0, f_chunk), :]
                b1c = b1_ref[pl.ds(f0, f_chunk), :]
                h = jnp.maximum(
                    jnp.dot(w1c, y_bf, preferred_element_type=f32) + b1c,
                    0.0).astype(bf16)
                w2c = w2_ref[:, pl.ds(f0, f_chunk)]
                return z_acc + jnp.dot(w2c, h, preferred_element_type=f32)

            z = jax.lax.fori_loop(0, n_f_chunks, body, jnp.zeros_like(y))

        z = z + b2

        # --- second residual + LayerNorm2 ------------------------------------
        t2 = z + y
        mu2 = jnp.sum(t2, axis=0, keepdims=True) * inv_c
        ex22 = jnp.sum(t2 * t2, axis=0, keepdims=True) * inv_c
        var2 = ex22 - mu2 * mu2
        out = (t2 - mu2) * jax.lax.rsqrt(var2 + 1e-5) * g2 + be2
        out_ref[...] = out.astype(out_ref.dtype)

    return kernel


# ----------------------------------------------------------------------------
# Tiling helpers (VMEM-budget aware).
# ----------------------------------------------------------------------------
def _vmem_capacity_bytes():
    try:
        return int(pltpu.get_tpu_info().vmem_capacity_bytes)
    except Exception:
        return 64 * 1024 * 1024        # conservative (v7x-class) fallback


def _pick_f_chunk(F, target=512):
    """Chunk the FFN hidden dim in 128-aligned slabs when F is large."""
    if F <= target:
        return F
    for c in (512, 384, 256, 128):
        if F % c == 0:
            return c
    return F                            # no aligned divisor: skip chunking


def _step_vmem_bytes(T, C, F, f_chunk, io_bytes):
    io = 2 * 2 * C * T * io_bytes       # x + out blocks, double-buffered
    tmp = 6 * C * T * 4                 # y / z / t2 / LN temporaries (estimate)
    hid = f_chunk * T * 6               # hidden chunk: f32 + bf16 copy
    weights = 2 * (C * F * 2) * 2       # w1 + w2 bf16 (double-buffered bound)
    cols = 2 * ((C * 6 + F) * 4)        # packed columns, attn column, b1
    return io + tmp + hid + weights + cols


def _pick_token_tile(hw_pad, max_tile, budget, C, F, f_chunk, io_bytes):
    cands = [k for k in range(128, max(min(max_tile, hw_pad), 128) + 1, 128)
             if hw_pad % k == 0]
    for k in sorted(cands, reverse=True):
        if _step_vmem_bytes(k, C, F, f_chunk, io_bytes) <= budget:
            return k
    return cands[0]                     # hw_pad is a multiple of 128


# ----------------------------------------------------------------------------
# Wrapper: hoisted attention column, parameter packing, pallas_call.
# ----------------------------------------------------------------------------
def cross_attention_forward(input_image, cls_embedding, params, *, io_dtype=None):
    B, C, H, W = input_image.shape
    HW = H * W
    io_dtype = input_image.dtype if io_dtype is None else io_dtype
    io_bytes = jnp.dtype(io_dtype).itemsize

    # Degenerate attention branch hoisted out of the grid: softmax over one key
    # is exactly 1.0, so the attention output is the per-batch channel column
    #     attn_col = wo @ (wv @ cls + bv) + bo
    # (tiny O(B*C*E) einsum; the q / wq / wk scores path has zero effect).
    val = jnp.einsum("ve,be->bv", params["wv"], cls_embedding) + params["bv"]
    attn_col = (jnp.einsum("cv,bv->bc", params["wo"], val) + params["bo"])
    attn_col = attn_col[:, :, None].astype(jnp.float32)            # [B, C, 1]

    # NCHW -> [B, C, HW] is a pure reshape (channels-major is the native
    # layout); the kernel works in [C, T] and reshapes straight back.
    x_cm = input_image.reshape(B, C, HW).astype(io_dtype)

    # Lane-pad tokens to a multiple of 128 (LayerNorms reduce over channels
    # only, so padded token columns are independent garbage we slice off).
    HW_pad = ((HW + 127) // 128) * 128
    if HW_pad != HW:
        x_cm = jnp.pad(x_cm, ((0, 0), (0, 0), (0, HW_pad - HW)))

    F = params["w1"].shape[0]
    f_chunk = _pick_f_chunk(F)
    n_f_chunks = F // f_chunk

    # Per-generation VMEM budget -> token tile.
    vmem_cap = _vmem_capacity_bytes()
    if vmem_cap >= 100 * 1024 * 1024:          # v5e / v6e: 128 MiB physical
        max_tile, vmem_limit = 4096, 96 * 1024 * 1024
    else:                                      # v7x-class: 64 MiB physical
        max_tile, vmem_limit = 1024, 32 * 1024 * 1024
    budget = vmem_limit - 4 * 1024 * 1024
    T = _pick_token_tile(HW_pad, max_tile, budget, C, F, f_chunk, io_bytes)
    n_t = HW_pad // T

    # Parameter packing.  Constant-index blocks are only DMA'd once by the
    # revolving-window pipeline, so they stay resident across the grid.
    # TODO(synk): padding C/F to 128/256-multiples (MXU K-alignment on v5e) is
    # a model-config lever; C-padding would perturb the LayerNorm statistics.
    w1_bf16 = params["w1"].astype(jnp.bfloat16)                    # [F, C]
    w2_bf16 = params["w2"].astype(jnp.bfloat16)                    # [C, F]
    b1_col = params["b1"][:, None].astype(jnp.float32)             # [F, 1]
    cols_c = jnp.stack(
        [params["g1"], params["be1"], params["b2"], params["g2"], params["be2"]],
        axis=1).astype(jnp.float32)                                # [C, 5]

    def full2d(arr):
        return pl.BlockSpec(arr.shape, lambda b, t: (0, 0))

    grid_spec = pltpu.PrefetchScalarGridSpec(
        num_scalar_prefetch=0,
        grid=(B, n_t),
        in_specs=[
            pl.BlockSpec((None, C, T), lambda b, t: (b, 0, t)),    # x tokens
            pl.BlockSpec((None, C, 1), lambda b, t: (b, 0, 0)),    # attn column
            full2d(cols_c),
            full2d(w1_bf16),
            full2d(b1_col),
            full2d(w2_bf16),
        ],
        out_specs=pl.BlockSpec((None, C, T), lambda b, t: (b, 0, t)),
    )

    out_cm = pl.pallas_call(
        _make_kernel(f_chunk, n_f_chunks),
        out_shape=jax.ShapeDtypeStruct((B, C, HW_pad), io_dtype),
        grid_spec=grid_spec,
        compiler_params=pltpu.CompilerParams(
            # Batch and token tiles are independent -> megacore can shard both.
            dimension_semantics=("parallel", "parallel"),
            vmem_limit_bytes=vmem_limit,
        ),
    )(x_cm, attn_col, cols_c, w1_bf16, b1_col, w2_bf16)

    if HW_pad != HW:
        out_cm = out_cm[:, :, :HW]
    return out_cm.reshape(B, C, H, W)


# ----------------------------------------------------------------------------
# Deterministic parameter init (PyTorch nn.Linear default: U(+-1/sqrt(fan_in))),
# weights stored in the PyTorch-native [out, in] layout.
# ----------------------------------------------------------------------------
def init_params(key, image_channel, query_size, value_size, feed_forward_size,
                cls_embedding_size):
    def linear(k, fan_in, fan_out):
        kw, kb = jax.random.split(k)
        bound = 1.0 / (fan_in ** 0.5)
        w = jax.random.uniform(kw, (fan_out, fan_in), jnp.float32, -bound, bound)
        b = jax.random.uniform(kb, (fan_out,), jnp.float32, -bound, bound)
        return w, b

    keys = jax.random.split(key, 6)
    wq, bq = linear(keys[0], image_channel, query_size)       # dead path (softmax==1)
    wk, bk = linear(keys[1], cls_embedding_size, query_size)  # dead path (softmax==1)
    wv, bv = linear(keys[2], cls_embedding_size, value_size)
    wo, bo = linear(keys[3], value_size, image_channel)
    w1, b1 = linear(keys[4], image_channel, feed_forward_size)
    w2, b2 = linear(keys[5], feed_forward_size, image_channel)
    ones_c = jnp.ones((image_channel,), jnp.float32)
    zeros_c = jnp.zeros((image_channel,), jnp.float32)
    return dict(
        wq=wq, bq=bq, wk=wk, bk=bk, wv=wv, bv=bv, wo=wo, bo=bo,
        w1=w1, b1=b1, w2=w2, b2=b2,
        g1=ones_c, be1=zeros_c, g2=ones_c, be2=zeros_c,
    )


# ----------------------------------------------------------------------------
# Pure-JAX reference mirroring the full PyTorch forward (including the
# degenerate softmax path), to confirm the hoisted attention column is exact.
# ----------------------------------------------------------------------------
def reference_forward(input_image, cls_embedding, p):
    B, C, H, W = input_image.shape
    hs = input_image.reshape(B, H * W, C)
    q = hs @ p["wq"].T + p["bq"]
    key = cls_embedding @ p["wk"].T + p["bk"]                        # [B, Q]
    val = cls_embedding @ p["wv"].T + p["bv"]                        # [B, V]
    scores = jnp.matmul(q, key[:, :, None]) * (q.shape[-1] ** -0.5)  # [B, HW, 1]
    probs = jax.nn.softmax(scores, axis=-1)
    attn = jnp.matmul(probs, val[:, None, :])                        # [B, HW, V]
    attn = attn @ p["wo"].T + p["bo"]                                # [B, HW, C]
    attn = attn.reshape(B, H, W, C)
    x = jnp.transpose(input_image, (0, 2, 3, 1))

    def ln(v, g, b):
        mu = jnp.mean(v, axis=-1, keepdims=True)
        var = jnp.mean((v - mu) ** 2, axis=-1, keepdims=True)
        return (v - mu) * jax.lax.rsqrt(var + 1e-5) * g + b

    y = ln(attn + x, p["g1"], p["be1"])
    z = jnp.maximum(y @ p["w1"].T + p["b1"], 0.0) @ p["w2"].T + p["b2"]
    out = ln(z + y, p["g2"], p["be2"])
    return jnp.transpose(out, (0, 3, 1, 2))


if __name__ == "__main__":
    # Small shapes consistent with the module's forward.
    B, C, H, W = 2, 4, 16, 16
    QUERY, VALUE, FF, CLS_E = 8, 8, 32, 16

    root = jax.random.PRNGKey(0)
    k_img, k_cls, k_par = jax.random.split(root, 3)
    input_image = jax.random.normal(k_img, (B, C, H, W), jnp.float32)
    cls_embedding = jax.random.normal(k_cls, (B, CLS_E), jnp.float32)
    params = init_params(k_par, C, QUERY, VALUE, FF, CLS_E)

    fwd = jax.jit(cross_attention_forward)
    out = jax.block_until_ready(fwd(input_image, cls_embedding, params))

    ref = reference_forward(input_image, cls_embedding, params)
    assert out.shape == (B, C, H, W)
    # Tolerance reflects bf16 MXU operands (f32 accumulation) in the FFN.
    assert jnp.allclose(out, ref, atol=3e-2, rtol=3e-2), "mismatch vs reference"

    print("KERNEL_OK")
</pallas_src>

<mosaic_0001>
module attributes {stable_mosaic.version = 11 : i64} {
  func.func @kernel(%arg0: i32, %arg1: i32, %arg2: memref<1x4x256xf32, #tpu.memory_space<vmem>>, %arg3: memref<1x4x1xf32, #tpu.memory_space<vmem>>, %arg4: memref<4x5xf32, #tpu.memory_space<vmem>>, %arg5: memref<32x4xbf16, #tpu.memory_space<vmem>>, %arg6: memref<32x1xf32, #tpu.memory_space<vmem>>, %arg7: memref<4x32xbf16, #tpu.memory_space<vmem>>, %arg8: memref<1x4x256xf32, #tpu.memory_space<vmem>>) attributes {dimension_semantics = [#tpu.dimension_semantics<parallel>, #tpu.dimension_semantics<parallel>], iteration_bounds = array<i64: 2, 1>, scalar_prefetch = 0 : i64, scratch_operands = 0 : i64, tpu.core_type = #tpu.core_type<tc>, window_params = [{transform_indices = @transform_0, window_bounds = array<i64: 1, 4, 256>}, {transform_indices = @transform_1, window_bounds = array<i64: 1, 4, 1>}, {pipeline_mode = #tpu.pipeline_mode<synchronous>, transform_indices = @transform_2, window_bounds = array<i64: 4, 5>}, {pipeline_mode = #tpu.pipeline_mode<synchronous>, transform_indices = @transform_3, window_bounds = array<i64: 32, 4>}, {pipeline_mode = #tpu.pipeline_mode<synchronous>, transform_indices = @transform_4, window_bounds = array<i64: 32, 1>}, {pipeline_mode = #tpu.pipeline_mode<synchronous>, transform_indices = @transform_5, window_bounds = array<i64: 4, 32>}, {transform_indices = @transform_6, window_bounds = array<i64: 1, 4, 256>}]} {
    %c0 = arith.constant 0 : index
    %c0_0 = arith.constant 0 : index
    %c0_1 = arith.constant 0 : index
    %0 = vector.load %arg2[%c0, %c0_0, %c0_1] : memref<1x4x256xf32, #tpu.memory_space<vmem>>, vector<1x4x256xf32>
    %1 = vector.shape_cast %0 : vector<1x4x256xf32> to vector<4x256xf32>
    %c0_2 = arith.constant 0 : index
    %c0_3 = arith.constant 0 : index
    %2 = vector.load %arg4[%c0_2, %c0_3] : memref<4x5xf32, #tpu.memory_space<vmem>>, vector<4x5xf32>
    %3 = vector.extract_strided_slice %2 {offsets = [0, 0], sizes = [4, 1], strides = [1, 1]} : vector<4x5xf32> to vector<4x1xf32>
    %4 = vector.extract_strided_slice %2 {offsets = [0, 1], sizes = [4, 1], strides = [1, 1]} : vector<4x5xf32> to vector<4x1xf32>
    %5 = vector.extract_strided_slice %2 {offsets = [0, 2], sizes = [4, 1], strides = [1, 1]} : vector<4x5xf32> to vector<4x1xf32>
    %6 = vector.extract_strided_slice %2 {offsets = [0, 3], sizes = [4, 1], strides = [1, 1]} : vector<4x5xf32> to vector<4x1xf32>
    %7 = vector.extract_strided_slice %2 {offsets = [0, 4], sizes = [4, 1], strides = [1, 1]} : vector<4x5xf32> to vector<4x1xf32>
    %c0_4 = arith.constant 0 : index
    %c0_5 = arith.constant 0 : index
    %c0_6 = arith.constant 0 : index
    %8 = vector.load %arg3[%c0_4, %c0_5, %c0_6] : memref<1x4x1xf32, #tpu.memory_space<vmem>>, vector<1x4x1xf32>
    %9 = vector.shape_cast %8 : vector<1x4x1xf32> to vector<4x1xf32>
    %10 = vector.broadcast %9 : vector<4x1xf32> to vector<4x256xf32>
    %11 = arith.addf %1, %10 : vector<4x256xf32>
    %cst = arith.constant dense<0.000000e+00> : vector<256xf32>
    %12 = vector.multi_reduction <add>, %11, %cst [0] : vector<4x256xf32> to vector<256xf32>
    %13 = vector.shape_cast %12 : vector<256xf32> to vector<1x256xf32>
    %cst_7 = arith.constant 2.500000e-01 : f32
    %14 = vector.broadcast %cst_7 : f32 to vector<1x256xf32>
    %15 = arith.mulf %13, %14 : vector<1x256xf32>
    %16 = arith.mulf %11, %11 : vector<4x256xf32>
    %cst_8 = arith.constant dense<0.000000e+00> : vector<256xf32>
    %17 = vector.multi_reduction <add>, %16, %cst_8 [0] : vector<4x256xf32> to vector<256xf32>
    %18 = vector.shape_cast %17 : vector<256xf32> to vector<1x256xf32>
    %cst_9 = arith.constant 2.500000e-01 : f32
    %19 = vector.broadcast %cst_9 : f32 to vector<1x256xf32>
    %20 = arith.mulf %18, %19 : vector<1x256xf32>
    %21 = arith.mulf %15, %15 : vector<1x256xf32>
    %22 = arith.subf %20, %21 : vector<1x256xf32>
    %23 = vector.broadcast %15 : vector<1x256xf32> to vector<4x256xf32>
    %24 = arith.subf %11, %23 : vector<4x256xf32>
    %cst_10 = arith.constant 9.99999974E-6 : f32
    %25 = vector.broadcast %cst_10 : f32 to vector<1x256xf32>
    %26 = arith.addf %22, %25 : vector<1x256xf32>
    %27 = math.rsqrt %26 : vector<1x256xf32>
    %28 = vector.broadcast %27 : vector<1x256xf32> to vector<4x256xf32>
    %29 = arith.mulf %24, %28 : vector<4x256xf32>
    %30 = vector.broadcast %3 : vector<4x1xf32> to vector<4x256xf32>
    %31 = arith.mulf %29, %30 : vector<4x256xf32>
    %32 = vector.broadcast %4 : vector<4x1xf32> to vector<4x256xf32>
    %33 = arith.addf %31, %32 : vector<4x256xf32>
    %34 = arith.truncf %33 : vector<4x256xf32> to vector<4x256xbf16>
    %c0_11 = arith.constant 0 : index
    %c0_12 = arith.constant 0 : index
    %35 = vector.load %arg5[%c0_11, %c0_12] : memref<32x4xbf16, #tpu.memory_space<vmem>>, vector<32x4xbf16>
    %cst_13 = arith.constant dense<0.000000e+00> : vector<32x256xf32>
    %36 = tpu.matmul %35, %34, %cst_13 {dimension_numbers = #tpu.dot_dimension_numbers<[1], [0], [0], [1], [0, 0, 1, 1], [], []>} : vector<32x4xbf16>, vector<4x256xbf16>, vector<32x256xf32> -> vector<32x256xf32>
    %c0_14 = arith.constant 0 : index
    %c0_15 = arith.constant 0 : index
    %37 = vector.load %arg6[%c0_14, %c0_15] : memref<32x1xf32, #tpu.memory_space<vmem>>, vector<32x1xf32>
    %38 = vector.broadcast %37 : vector<32x1xf32> to vector<32x256xf32>
    %39 = arith.addf %36, %38 : vector<32x256xf32>
    %cst_16 = arith.constant 0.000000e+00 : f32
    %40 = vector.broadcast %cst_16 : f32 to vector<32x256xf32>
    %41 = arith.maximumf %39, %40 : vector<32x256xf32>
    %42 = arith.truncf %41 : vector<32x256xf32> to vector<32x256xbf16>
    %c0_17 = arith.constant 0 : index
    %c0_18 = arith.constant 0 : index
    %43 = vector.load %arg7[%c0_17, %c0_18] : memref<4x32xbf16, #tpu.memory_space<vmem>>, vector<4x32xbf16>
    %cst_19 = arith.constant dense<0.000000e+00> : vector<4x256xf32>
    %44 = tpu.matmul %43, %42, %cst_19 {dimension_numbers = #tpu.dot_dimension_numbers<[1], [0], [0], [1], [0, 0, 1, 1], [], []>} : vector<4x32xbf16>, vector<32x256xbf16>, vector<4x256xf32> -> vector<4x256xf32>
    %45 = vector.broadcast %5 : vector<4x1xf32> to vector<4x256xf32>
    %46 = arith.addf %44, %45 : vector<4x256xf32>
    %47 = arith.addf %46, %33 : vector<4x256xf32>
    %cst_20 = arith.constant dense<0.000000e+00> : vector<256xf32>
    %48 = vector.multi_reduction <add>, %47, %cst_20 [0] : vector<4x256xf32> to vector<256xf32>
    %49 = vector.shape_cast %48 : vector<256xf32> to vector<1x256xf32>
    %cst_21 = arith.constant 2.500000e-01 : f32
    %50 = vector.broadcast %cst_21 : f32 to vector<1x256xf32>
    %51 = arith.mulf %49, %50 : vector<1x256xf32>
    %52 = arith.mulf %47, %47 : vector<4x256xf32>
    %cst_22 = arith.constant dense<0.000000e+00> : vector<256xf32>
    %53 = vector.multi_reduction <add>, %52, %cst_22 [0] : vector<4x256xf32> to vector<256xf32>
    %54 = vector.shape_cast %53 : vector<256xf32> to vector<1x256xf32>
    %cst_23 = arith.constant 2.500000e-01 : f32
    %55 = vector.broadcast %cst_23 : f32 to vector<1x256xf32>
    %56 = arith.mulf %54, %55 : vector<1x256xf32>
    %57 = arith.mulf %51, %51 : vector<1x256xf32>
    %58 = arith.subf %56, %57 : vector<1x256xf32>
    %59 = vector.broadcast %51 : vector<1x256xf32> to vector<4x256xf32>
    %60 = arith.subf %47, %59 : vector<4x256xf32>
    %cst_24 = arith.constant 9.99999974E-6 : f32
    %61 = vector.broadcast %cst_24 : f32 to vector<1x256xf32>
    %62 = arith.addf %58, %61 : vector<1x256xf32>
    %63 = math.rsqrt %62 : vector<1x256xf32>
    %64 = vector.broadcast %63 : vector<1x256xf32> to vector<4x256xf32>
    %65 = arith.mulf %60, %64 : vector<4x256xf32>
    %66 = vector.broadcast %6 : vector<4x1xf32> to vector<4x256xf32>
    %67 = arith.mulf %65, %66 : vector<4x256xf32>
    %68 = vector.broadcast %7 : vector<4x1xf32> to vector<4x256xf32>
    %69 = arith.addf %67, %68 : vector<4x256xf32>
    %c0_25 = arith.constant 0 : index
    %c0_26 = arith.constant 0 : index
    %c0_27 = arith.constant 0 : index
    %70 = vector.load %arg8[%c0_25, %c0_26, %c0_27] : memref<1x4x256xf32, #tpu.memory_space<vmem>>, vector<1x4x256xf32>
    %71 = vector.shape_cast %70 : vector<1x4x256xf32> to vector<4x256xf32>
    %72 = vector.shape_cast %69 : vector<4x256xf32> to vector<1x4x256xf32>
    tpu.vector_store %arg8[%c0_25, %c0_26, %c0_27], %72 {strides = array<i32>} : memref<1x4x256xf32, #tpu.memory_space<vmem>>, vector<1x4x256xf32>,
    return
  }
  func.func @transform_0(%arg0: i32, %arg1: i32) -> (i32, i32, i32) {
    %c0_i32 = arith.constant 0 : i32
    %c0_i32_0 = arith.constant 0 : i32
    return %arg0, %c0_i32, %arg1 : i32, i32, i32
  }
  func.func @transform_1(%arg0: i32, %arg1: i32) -> (i32, i32, i32) {
    %c0_i32 = arith.constant 0 : i32
    %c0_i32_0 = arith.constant 0 : i32
    %c0_i32_1 = arith.constant 0 : i32
    return %arg0, %c0_i32, %c0_i32_0 : i32, i32, i32
  }
  func.func @transform_2(%arg0: i32, %arg1: i32) -> (i32, i32) {
    %c0_i32 = arith.constant 0 : i32
    %c0_i32_0 = arith.constant 0 : i32
    %c0_i32_1 = arith.constant 0 : i32
    return %c0_i32, %c0_i32_0 : i32, i32
  }
  func.func @transform_3(%arg0: i32, %arg1: i32) -> (i32, i32) {
    %c0_i32 = arith.constant 0 : i32
    %c0_i32_0 = arith.constant 0 : i32
    %c0_i32_1 = arith.constant 0 : i32
    return %c0_i32, %c0_i32_0 : i32, i32
  }
  func.func @transform_4(%arg0: i32, %arg1: i32) -> (i32, i32) {
    %c0_i32 = arith.constant 0 : i32
    %c0_i32_0 = arith.constant 0 : i32
    %c0_i32_1 = arith.constant 0 : i32
    return %c0_i32, %c0_i32_0 : i32, i32
  }
  func.func @transform_5(%arg0: i32, %arg1: i32) -> (i32, i32) {
    %c0_i32 = arith.constant 0 : i32
    %c0_i32_0 = arith.constant 0 : i32
    %c0_i32_1 = arith.constant 0 : i32
    return %c0_i32, %c0_i32_0 : i32, i32
  }
  func.func @transform_6(%arg0: i32, %arg1: i32) -> (i32, i32, i32) {
    %c0_i32 = arith.constant 0 : i32
    %c0_i32_0 = arith.constant 0 : i32
    return %arg0, %c0_i32, %arg1 : i32, i32, i32
  }
}

</mosaic_0001>

<bundles_post_ra>
// kernel: cross_attention_forward.1
= control target key start
LH: loop header
LB: loop body
LE: loop exit
PB: predicated region body
PF: predicated region fallthrough
CT: control target
= control target key end

     0   :  { %s898_s21 = smov 0   ;;  %s900_s22 = smov 0   ;;  %s1007_s0 = inlined_call_operand.vmem [shape: f32[2,4,256], index: 0, kind: input, shape index: {}]   ;;  %s1008_s1 = inlined_call_operand.vmem [shape: f32[2,4,1], index: 1, kind: input, shape index: {}]   ;;  %s1009_s2 = inlined_call_operand.vmem [shape: f32[4,5], index: 2, kind: input, shape index: {}]   ;;  %s1010_s3 = inlined_call_operand.vmem [shape: bf16[32,4], index: 3, kind: input, shape index: {}]   ;;  %s1011_s4 = inlined_call_operand.vmem [shape: f32[32,1], index: 4, kind: input, shape index: {}]   ;;  %s1012_s5 = inlined_call_operand.vmem [shape: bf16[4,32], index: 5, kind: input, shape index: {}]   ;;  %s1013_s6 = inlined_call_operand.vmem [shape: f32[2,4,256], index: 6, kind: output, shape index: {}]  }
   0x1   :  { %s902_s23 = smov 0  }
   0x2 LB: > { %s28_s24 = sadd.s32 1, %s851_s22  ;;  %p762_p0 = scmp.ge.s32.totalorder %s855_s23, 1  ;;  %s855_s23 = sphi %s902_s23, %s16_s23   ;;  %s851_s22 = sphi %s900_s22, %s1015_s22   ;;  %s847_s21 = sphi %s898_s21, %s1014_s21  }
   0x3   : > { %p30_p1 = scmp.ge.s32.totalorder %s28_s24, 2  ;;  %p242_p2 = scmp.lt.s32.totalorder %s855_s23, 3 }
   0x5   : > { %s1017_s24 = smov (%p30_p1, %s28_s24), 0  ;;  %p243_p3 = pnand %p762_p0, %p242_p2 }
   0x6   : > { %p285_p4 = scmp.lt.s32.totalorder (!%p243_p3), %s847_s21, 1 }
   0x7   : > { %246 = sbr.rel (%p243_p3) target bundleno = 561 (0x231), region = 44 }
   0xc   : > { %v857_v0 = vmov 0   ;;  %v919_v1 = vld [vmem:[%s1009_s2] sm:$0xf]  ;;  %v858_v2 = vmov 1   ;;  %s1019_s21 = smov (!%p285_p4, %s847_s21), 1  ;;  %v438_v4 = vld [vmem:[%s1011_s4 + $0x8] sm:$0xff] }
   0xd   : > { %818 = vset.pattern.permute.xlu0 %v857_v0  ;;  %819 = vset.pattern.permute.xlu1 %v858_v2  ;;  %s765_s27 = sshll.u32 %s1019_s21, 2  ;;  %v859_v5 = vmov 839922192   ;;  %s784_s9 = sshll.u32 %s1019_s21, 3  ;;  %vm328_vm0 = vcmask 1043456   ;;  %vm478_vm7 = vcmask 1041408  }
   0xe   : > { %417 = vperm.xlu1 %819, %v919_v1   ;;  %821 = vset.pattern.permute.xlu2 %v857_v0  ;;  %s297_s30 = scalar_lea.vmem %s1008_s1, %s765_s27  ;;  %v317_v6 = vunpack.c.l.s4 %v859_v5  ;;  %s292_s12 = scalar_lea.vmem %s1007_s0, %s784_s9  ;;  %vm471_vm8 = vcmask 31744   ;;  %vm540_vm9 = vcmask 261120  }
   0xf   : > { %v311_v3 = vld [vmem:[%s297_s30] sm:$0xf]  ;;  %s306_s7 = scalar_lea.vmem %s1013_s6, %s784_s9 }
  0x10   : > { %314 = vperm.xlu0 %818, %v311_v3   ;;  %v933_v7 = vunpack.c.0.s8 %v317_v6  ;;  %v309_v9 = vld [vmem:[%s292_s12] sm:$0xff] }
  0x16   : > { %820 = vset.pattern.permute.xlu1 %v857_v0 }
  0x18   : > { %408 = vperm.xlu0 %818, %v919_v1  }
  0x20   : > { %448 = vperm.xlu0 %818, %v438_v4  }
  0x82   : > { %v315_v8 = vpop.permute.xlu0 %314 }
  0x83   : > { %v319_v10 = vperm.slane %v315_v8, %v933_v7 }
  0x85   : > { %v941_v11 = vadd.f32 %v319_v10, %v309_v9  ;;  %v418_v10 = vpop.permute.xlu1 %417 }
  0x87   : > { %323 = vst [vmem:[#allocation1] ss:$2 sm:$0xff] %v941_v11  ;;  %v345_v12 = vmul.f32 %v941_v11, %v941_v11 }
  0x8a   : > { %v409_v8 = vpop.permute.xlu0 %408 }
  0x8e   : > { %v324_v13 = vld.sshfl [vmem:[#allocation1] sm:$0xff pattern:$0x75316420]  ;;  %v325_v14 = vld.sshfl [vmem:[#allocation1 + $0x8] sm:$0xff pattern:$0x75316420] }
  0x8f   : > { %v336_v15 = vsel %vm328_vm0, %v325_v14, 0.0  ;;  %347 = vst [vmem:[#allocation1] ss:$2 sm:$0xff] %v345_v12  ;;  %v329_v16 = vsel %vm328_vm0, %v324_v13, 0.0 }
  0x90   : > { %v337_v17 = vrot.slane %v336_v15, 4  ;;  %v330_v18 = vrot.slane %v329_v16, 4 }
  0x92   : > { %v331_v19 = vadd.f32 %v330_v18, %v329_v16  ;;  %v338_v20 = vadd.f32 %v337_v17, %v336_v15  ;;  %v413_v16 = vperm.slane %v409_v8, %v933_v7  ;;  %v422_v17 = vperm.slane %v418_v10, %v933_v7 }
  0x94   : > { %v332_v21 = vrot.slane %v331_v19, 2  ;;  %v339_v22 = vrot.slane %v338_v20, 2 }
  0x96   : > { %v333_v23 = vadd.f32 %v332_v21, %v331_v19  ;;  %v340_v24 = vadd.f32 %v339_v22, %v338_v20  ;;  %v348_v25 = vld.sshfl [vmem:[#allocation1] sm:$0xff pattern:$0x75316420]  ;;  %v349_v26 = vld.sshfl [vmem:[#allocation1 + $0x8] sm:$0xff pattern:$0x75316420] }
  0x97   : > { %v352_v27 = vsel %vm328_vm0, %v348_v25, 0.0  ;;  %v359_v28 = vsel %vm328_vm0, %v349_v26, 0.0  ;;  %v440_v20 = vld [vmem:[%s1011_s4 + $0x18] sm:$0xff]  ;;  %v439_v21 = vld [vmem:[%s1011_s4 + $0x10] sm:$0xff] }
  0x98   : > { %v334_v29 = vrot.slane %v333_v23, 1  ;;  %v341_v30 = vrot.slane %v340_v24, 1  ;;  %v353_v31 = vrot.slane %v352_v27, 4  ;;  %v360_v32 = vrot.slane %v359_v28, 4  ;;  %458 = vperm.xlu2 %821, %v440_v20   ;;  %453 = vperm.xlu1 %820, %v439_v21  }
  0x9a   : > { %v354_v33 = vadd.f32 %v353_v31, %v352_v27  ;;  %v361_v34 = vadd.f32 %v360_v32, %v359_v28  ;;  %v335_v35 = vadd.f32 %v334_v29, %v333_v23  ;;  %v342_v36 = vadd.f32 %v341_v30, %v340_v24  ;;  %v786_v27 = vld [vmem:[%s1010_s3] sm:$0xff]  ;;  %v787_v28 = vld [vmem:[%s1010_s3 + $0x8] sm:$0xff] }
  0x9b   : > { %v860_v31 = vmov 2   ;;  %v861_v32 = vmov 4  }
  0x9c   : > { %v355_v37 = vrot.slane %v354_v33, 2  ;;  %v362_v38 = vrot.slane %v361_v34, 2  ;;  %v343_v41 = vmul.f32 0.25, %v335_v35  ;;  %v344_v42 = vmul.f32 0.25, %v342_v36  ;;  %824 = vset.pattern.permute.xlu0 %v861_v32 }
  0x9d   : > { %648 = vperm.xlu0 %824, %v919_v1   ;;  %v862_v35 = vmov 3  }
  0x9e   : > { %v356_v39 = vadd.f32 %v355_v37, %v354_v33  ;;  %v363_v40 = vadd.f32 %v362_v38, %v361_v34  ;;  %v368_v49 = vmul.f32 %v343_v41, %v343_v41  ;;  %v369_v50 = vmul.f32 %v344_v42, %v344_v42 }
  0x9f   : > { %v374_v63 = vrot.slane %v344_v42, 4 }
  0xa0   : > { %v357_v43 = vrot.slane %v356_v39, 1  ;;  %v364_v44 = vrot.slane %v363_v40, 1  ;;  %822 = vset.pattern.permute.xlu1 %v860_v31 }
  0xa1   : > { %v375_v5 = vsel %vm328_vm0, %v343_v41, %v374_v63  ;;  %537 = vperm.xlu1 %822, %v919_v1   ;;  %v535_v63 = vld [vmem:[%s1012_s5] sm:$0x3] }
  0xa2   : > { %v358_v45 = vadd.f32 %v357_v43, %v356_v39  ;;  %v365_v46 = vadd.f32 %v364_v44, %v363_v40  ;;  %v377_v12 = vsub.f32 %v941_v11, %v375_v5  ;;  %v437_v11 = vld [vmem:[%s1011_s4] sm:$0xff]  ;;  %v449_v40 = vpop.permute.xlu0 %448 }
  0xa3   : > { %443 = vperm.xlu2 %821, %v437_v11  }
  0xa4   : > { %v366_v47 = vmul.f32 0.25, %v358_v45  ;;  %v367_v48 = vmul.f32 0.25, %v365_v46 }
  0xa6   : > { %v370_v51 = vsub.f32 %v366_v47, %v368_v49  ;;  %v371_v52 = vsub.f32 %v367_v48, %v369_v50 }
  0xa8   : > { %v378_v53 = vadd.f32 1e-05, %v370_v51  ;;  %v379_v54 = vadd.f32 1e-05, %v371_v52 }
  0xaa   : > { %825 = vrsqrt.f32 %v378_v53  ;;  %vm396_vm3 = vweird.f32 %v379_v54  ;;  %vm386_vm5 = vweird.f32 %v378_v53 }
  0xab   : > { %827 = vrsqrt.f32 %v379_v54  ;;  %823 = vset.pattern.permute.xlu2 %v862_v35 }
  0xac   : > { %642 = vperm.xlu2 %823, %v919_v1  }
  0xb0   : > { %v826_v55 = vpop.eup %825 }
  0xb1   : > { %v828_v56 = vpop.eup %827  ;;  %v381_v57 = vmul.f32 %v826_v55, %v378_v53  ;;  %vm387_vm2 = vweird.f32 %v826_v55 }
  0xb2   : > { %v391_v58 = vmul.f32 %v828_v56, %v379_v54  ;;  %vm397_vm1 = vweird.f32 %v828_v56  ;;  %vm388_vm6 = vmor %vm386_vm5, %vm387_vm2 }
  0xb3   : > { %v382_v59 = vmul.f32 %v826_v55, %v381_v57  ;;  %vm398_vm4 = vmor %vm396_vm3, %vm397_vm1 }
  0xb4   : > { %v392_v60 = vmul.f32 %v828_v56, %v391_v58 }
  0xb5   : > { %v383_v61 = vmul.f32 0.5, %v382_v59 }
  0xb6   : > { %v393_v62 = vmul.f32 0.5, %v392_v60 }
  0xb7   : > { %v384_v0 = vsub.f32 1.5, %v383_v61 }
  0xb8   : > { %v394_v2 = vsub.f32 1.5, %v393_v62 }
  0xb9   : > { %v385_v3 = vmul.f32 %v826_v55, %v384_v0 }
  0xba   : > { %v395_v4 = vmul.f32 %v828_v56, %v394_v2 }
  0xbb   : > { %v389_v13 = vsel %vm388_vm6, %v826_v55, %v385_v3 }
  0xbc   : > { %v399_v6 = vsel %vm398_vm4, %v828_v56, %v395_v4 }
  0xbd   : > { %v402_v9 = vrot.slane %v399_v6, 4 }
  0xbf   : > { %v403_v14 = vsel %vm328_vm0, %v389_v13, %v402_v9 }
  0xc0   : > { %v405_v15 = vmul.f32 %v403_v14, %v377_v12 }
  0xc2   : > { %v415_v18 = vmul.f32 %v413_v16, %v405_v15 }
  0xc4   : > { %v424_v19 = vadd.f32 %v422_v17, %v415_v18 }
  0xc6   : > { %426 = vst [vmem:[#allocation1] ss:$2 sm:$0xff] %v424_v19 }
  0xcd   : > { %v427_v22 = vld.sshfl [vmem:[#allocation1] sm:$0xff pattern:$0x75316420]  ;;  %v428_v7 = vld.sshfl [vmem:[#allocation1 + $0x8] sm:$0xff pattern:$0x75316420] }
  0xce   : > { %v431_v23 = vpack.c.bf16 %v427_v22, %v427_v22  ;;  %v432_v24 = vpack.c.bf16 %v428_v7, %v428_v7  ;;  %570 = vst [vmem:[#allocation1] ss:$2 sm:$0xff] %v424_v19 }
  0xd0   : > { %v480_v25 = vsel %vm478_vm7, %v431_v23, 0  ;;  %v483_v26 = vsel %vm478_vm7, %v432_v24, 0 }
  0xd1   : > { %492 = vmatpush.bf16.msra.mxu0 %v480_v25  ;;  %511 = vmatpush.bf16.msra.mxu1 %v483_v26 }
  0xd4   : > { %776 = vmatmul.msk.bf16.vlgmr.msra.gmra.mxu0 %vm471_vm8, %v786_v27  ;;  %778 = vmatmul.msk.bf16.vlgmr.msra.gmra.mxu1 %vm471_vm8, %v786_v27 }
  0xd5   : > { %v571_v6 = vld.sshfl [vmem:[#allocation1] sm:$0xff pattern:$0x75316420]  ;;  %v572_v8 = vld.sshfl [vmem:[#allocation1 + $0x8] sm:$0xff pattern:$0x75316420] }
  0xe4   : > { %777 = vmatmul.msk.bf16.gmra.mxu0 %vm471_vm8, %v787_v28  ;;  %779 = vmatmul.msk.bf16.gmra.mxu1 %vm471_vm8, %v787_v28 }
  0xf2   : > { %v459_v36 = vpop.permute.xlu2 %458 }
  0xfd   : > { %v444_v41 = vpop.permute.xlu2 %443 }
 0x10a   : > { %v454_v39 = vpop.permute.xlu1 %453 }
 0x113   : > { %v538_v0 = vpop.permute.xlu1 %537 }
 0x151   : > { %v494_v29 = vpop.f32.mrf.mxu0  ;;  %v513_v30 = vpop.f32.mrf.mxu1 }
 0x152   : > { %v495_v50 = vadd.f32 %v494_v29, %v444_v41  ;;  %v514_v51 = vadd.f32 %v513_v30, %v444_v41 }
 0x154   : > { %v523_v59 = vmax.f32 %v495_v50, 0.0  ;;  %v524_v60 = vmax.f32 %v514_v51, 0.0 }
 0x159   : > { %v496_v33 = vpop.f32.mrf.mxu0  ;;  %v515_v34 = vpop.f32.mrf.mxu1 }
 0x15a   : > { %v497_v46 = vadd.f32 %v496_v33, %v449_v40  ;;  %v516_v47 = vadd.f32 %v515_v34, %v449_v40 }
 0x15c   : > { %v525_v55 = vmax.f32 %v497_v46, 0.0  ;;  %v526_v56 = vmax.f32 %v516_v47, 0.0 }
 0x15e   : > { %v531_v61 = vpack.c.bf16 %v525_v55, %v523_v59  ;;  %v532_v62 = vpack.c.bf16 %v526_v56, %v524_v60 }
 0x161   : > { %v499_v37 = vpop.f32.mrf.mxu0  ;;  %v518_v38 = vpop.f32.mrf.mxu1 }
 0x162   : > { %v500_v42 = vadd.f32 %v499_v37, %v454_v39  ;;  %v519_v43 = vadd.f32 %v518_v38, %v454_v39 }
 0x164   : > { %v527_v52 = vmax.f32 %v500_v42, 0.0  ;;  %v528_v53 = vmax.f32 %v519_v43, 0.0 }
 0x169   : > { %v501_v44 = vpop.f32.mrf.mxu0  ;;  %v520_v45 = vpop.f32.mrf.mxu1 }
 0x16a   : > { %v502_v48 = vadd.f32 %v501_v44, %v459_v36  ;;  %v521_v49 = vadd.f32 %v520_v45, %v459_v36 }
 0x16c   : > { %v529_v54 = vmax.f32 %v502_v48, 0.0  ;;  %v530_v1 = vmax.f32 %v521_v49, 0.0 }
 0x16e   : > { %v533_v57 = vpack.c.bf16 %v529_v54, %v527_v52  ;;  %v534_v58 = vpack.c.bf16 %v530_v1, %v528_v53 }
 0x170   : > { %550 = vmatpush.bf16.msra.mxu2 %v533_v57  ;;  %563 = vmatpush.bf16.msra.mxu3 %v534_v58 }
 0x174   : > { %551 = vmatpush.bf16.msra.mxu2 %v531_v61  ;;  %564 = vmatpush.bf16.msra.mxu3 %v532_v62 }
 0x177   : > { %780 = vmatmul.msk.bf16.vlgmr.msra.gmra.mxu2 %vm540_vm9, %v535_v63  ;;  %781 = vmatmul.msk.bf16.vlgmr.msra.gmra.mxu3 %vm540_vm9, %v535_v63 }
 0x1fa   : > { %v553_v2 = vpop.f32.mrf.mxu2  ;;  %v566_v3 = vpop.f32.mrf.mxu3 }
 0x1fb   : > { %v554_v4 = vadd.f32 %v553_v2, %v538_v0  ;;  %v567_v5 = vadd.f32 %v566_v3, %v538_v0  ;;  %v643_v3 = vpop.permute.xlu2 %642 }
 0x1fd   : > { %v976_v9 = vadd.f32 %v571_v6, %v554_v4  ;;  %v978_v10 = vadd.f32 %v572_v8, %v567_v5  ;;  %v649_v8 = vpop.permute.xlu0 %648 }
 0x1ff   : > { %v577_v12 = vsel %vm328_vm0, %v976_v9, 0.0  ;;  %v593_v13 = vmul.f32 %v976_v9, %v976_v9  ;;  %v584_v14 = vsel %vm328_vm0, %v978_v10, 0.0  ;;  %v594_v15 = vmul.f32 %v978_v10, %v978_v10 }
 0x200   : > { %v578_v16 = vrot.slane %v577_v12, 4  ;;  %v585_v17 = vrot.slane %v584_v14, 4 }
 0x201   : > { %v595_v18 = vsel %vm328_vm0, %v593_v13, 0.0  ;;  %v602_v19 = vsel %vm328_vm0, %v594_v15, 0.0 }
 0x202   : > { %v579_v20 = vadd.f32 %v578_v16, %v577_v12  ;;  %v596_v21 = vrot.slane %v595_v18, 4  ;;  %v586_v11 = vadd.f32 %v585_v17, %v584_v14  ;;  %v603_v22 = vrot.slane %v602_v19, 4  ;;  %v555_v7 = vpop.f32.mrf.mxu2  ;;  %v568_v23 = vpop.f32.mrf.mxu3 }
 0x204   : > { %v580_v24 = vrot.slane %v579_v20, 2  ;;  %v597_v25 = vadd.f32 %v596_v21, %v595_v18  ;;  %v587_v26 = vrot.slane %v586_v11, 2  ;;  %v604_v27 = vadd.f32 %v603_v22, %v602_v19 }
 0x206   : > { %v598_v28 = vrot.slane %v597_v25, 2  ;;  %v605_v29 = vrot.slane %v604_v27, 2  ;;  %v581_v30 = vadd.f32 %v580_v24, %v579_v20  ;;  %v588_v31 = vadd.f32 %v587_v26, %v586_v11 }
 0x208   : > { %v599_v32 = vadd.f32 %v598_v28, %v597_v25  ;;  %v606_v33 = vadd.f32 %v605_v29, %v604_v27  ;;  %v582_v34 = vrot.slane %v581_v30, 1  ;;  %v589_v35 = vrot.slane %v588_v31, 1 }
 0x20a   : > { %v600_v36 = vrot.slane %v599_v32, 1  ;;  %v607_v37 = vrot.slane %v606_v33, 1  ;;  %v583_v38 = vadd.f32 %v582_v34, %v581_v30  ;;  %v590_v39 = vadd.f32 %v589_v35, %v588_v31 }
 0x20c   : > { %v591_v40 = vmul.f32 0.25, %v583_v38  ;;  %v592_v41 = vmul.f32 0.25, %v590_v39  ;;  %v601_v42 = vadd.f32 %v600_v36, %v599_v32  ;;  %v608_v43 = vadd.f32 %v607_v37, %v606_v33 }
 0x20e   : > { %v609_v44 = vmul.f32 0.25, %v601_v42  ;;  %v610_v45 = vmul.f32 0.25, %v608_v43  ;;  %v611_v46 = vmul.f32 %v591_v40, %v591_v40  ;;  %v612_v47 = vmul.f32 %v592_v41, %v592_v41 }
 0x20f   : > { %v615_v62 = vsub.f32 %v976_v9, %v591_v40  ;;  %v616_v0 = vsub.f32 %v978_v10, %v592_v41 }
 0x210   : > { %v613_v48 = vsub.f32 %v609_v44, %v611_v46  ;;  %v614_v49 = vsub.f32 %v610_v45, %v612_v47 }
 0x212   : > { %v617_v50 = vadd.f32 1e-05, %v613_v48  ;;  %v618_v51 = vadd.f32 1e-05, %v614_v49 }
 0x214   : > { %829 = vrsqrt.f32 %v617_v50  ;;  %vm625_vm12 = vweird.f32 %v617_v50  ;;  %vm635_vm14 = vweird.f32 %v618_v51 }
 0x215   : > { %831 = vrsqrt.f32 %v618_v51 }
 0x21a   : > { %v830_v52 = vpop.eup %829 }
 0x21b   : > { %v832_v53 = vpop.eup %831  ;;  %v620_v54 = vmul.f32 %v830_v52, %v617_v50  ;;  %vm626_vm10 = vweird.f32 %v830_v52 }
 0x21c   : > { %v630_v1 = vmul.f32 %v832_v53, %v618_v51  ;;  %vm636_vm11 = vweird.f32 %v832_v53  ;;  %vm627_vm13 = vmor %vm625_vm12, %vm626_vm10 }
 0x21d   : > { %v621_v55 = vmul.f32 %v830_v52, %v620_v54  ;;  %vm637_vm15 = vmor %vm635_vm14, %vm636_vm11 }
 0x21e   : > { %v631_v56 = vmul.f32 %v832_v53, %v630_v1 }
 0x21f   : > { %v622_v57 = vmul.f32 0.5, %v621_v55 }
 0x220   : > { %v632_v58 = vmul.f32 0.5, %v631_v56 }
 0x221   : > { %v623_v59 = vsub.f32 1.5, %v622_v57 }
 0x222   : > { %v633_v60 = vsub.f32 1.5, %v632_v58 }
 0x223   : > { %v624_v61 = vmul.f32 %v830_v52, %v623_v59 }
 0x224   : > { %v634_v63 = vmul.f32 %v832_v53, %v633_v60 }
 0x225   : > { %v628_v2 = vsel %vm627_vm13, %v830_v52, %v624_v61 }
 0x226   : > { %v638_v4 = vsel %vm637_vm15, %v832_v53, %v634_v63  ;;  %v639_v5 = vmul.f32 %v628_v2, %v615_v62 }
 0x227   : > { %v640_v6 = vmul.f32 %v638_v4, %v616_v0 }
 0x228   : > { %v645_v12 = vmul.f32 %v643_v3, %v639_v5 }
 0x229   : > { %v646_v13 = vmul.f32 %v643_v3, %v640_v6 }
 0x22a   : > { %v651_v9 = vadd.f32 %v649_v8, %v645_v12 }
 0x22b   : > { %v652_v14 = vadd.f32 %v649_v8, %v646_v13 }
 0x22d   : > { %v655_v15 = vrot.slane %v652_v14, 4 }
 0x22f   : > { %v656_v16 = vsel %vm328_vm0, %v651_v9, %v655_v15 }
 0x230   : > { %658 = vst [vmem:[%s306_s7] sm:$0xff] %v656_v16 }
 0x231 PF: > { %s16_s23 = sadd.s32 1, %s855_s23   ;;  %s1014_s21 = smov %s851_s22 }
 0x232   : > { %p13_p5 = scmp.ge.s32.totalorder %s16_s23, 4   ;;  %s1015_s22 = smov %s1017_s24 }
 0x234   :  { %15 = sbr.rel (!%p13_p5) target bundleno = 2 (0x2), region = 77 }

</bundles_post_ra>
